<compile_context>
chip_gen: v6e
topology: v6e:2x2x1
jax: 0.10.0
libtpu: 0.0.40
codegen_flags: <defaults>
</compile_context>

<pallas_src>
import jax
import jax.numpy as jnp
from jax.experimental import pallas as pl
from jax.experimental.pallas import tpu as pltpu


_TARGET_TILE_BYTES = 8 * 1024 * 1024   # per-tile; 2x in + 2x out buffers ~= 32 MiB peak
_VMEM_LIMIT_BYTES = 48 * 1024 * 1024   # > v5e's 16 MiB scoped default, <= v7x's 64 MiB
_SMALL_OUT_BYTES = 4 * 1024 * 1024     # below this, plain XLA slice beats a kernel launch


def _copy_kernel(x_ref, o_ref):
    # Time-tiled path: in/out blocks are the same (tb, tl) window of [0, l_out).
    o_ref[...] = x_ref[...]


def _prefix_kernel(x_ref, o_ref):
    # Full-row path: x_ref is (tb, L), o_ref is (tb, l_out); static prefix slice.
    o_ref[...] = x_ref[:, : o_ref.shape[-1]]


def _sublane_multiple(dtype) -> int:
    return {4: 8, 2: 16, 1: 32}.get(jnp.dtype(dtype).itemsize, 8)


def _row_tile(rows: int, width: int, itemsize: int, sub: int) -> int:
    """Largest sublane-aligned row tile with width*tb*itemsize ~= target bytes."""
    tb = max(1, _TARGET_TILE_BYTES // max(1, width * itemsize))
    if tb >= rows:
        return rows                      # full dim: always a legal block dim
    tb = max(sub, (tb // sub) * sub)
    return min(tb, rows)


def chomp1d(x: jax.Array, chomp_size: int, *, force_pallas: bool = False) -> jax.Array:
    """Equivalent of Chomp1d(chomp_size)(x) for x of shape (N, C, L).

    Note: chomp_size == 0 / chomp_size >= L are rejected (PyTorch would return
    an empty / wrapped slice); a TCN always uses 0 < chomp_size < L.
    """
    assert x.ndim == 3, "expected (N, C, L) input"
    n, c, l = x.shape
    assert 0 < chomp_size < l, "chomp_size must be in (0, L)"
    l_out = l - chomp_size

    itemsize = jnp.dtype(x.dtype).itemsize
    rows = n * c

    # Small-shape cutoff: let XLA do the slice (and fuse it into the consumer).
    if not force_pallas and (l_out < 128 or rows * l_out * itemsize < _SMALL_OUT_BYTES):
        return x[:, :, :l_out]

    x2 = x.reshape(rows, l)
    sub = _sublane_multiple(x.dtype)

    def _params(sem):
        return pltpu.CompilerParams(
            dimension_semantics=sem, vmem_limit_bytes=_VMEM_LIMIT_BYTES)

    # Traffic-vs-stride decision: if the chomped tail is tiny (<= ~3% of L), a
    # contiguous full-row read is more DMA-efficient than skipping the tail.
    tiny_tail = (chomp_size * 32 <= l) and (sub * l * itemsize <= _TARGET_TILE_BYTES)

    if l_out < 128 or tiny_tail:
        # Contiguous full-row read; prefix slice in VMEM. Row-tiled grid only.
        tb = _row_tile(rows, l, itemsize, sub)
        out2 = pl.pallas_call(
            _prefix_kernel,
            out_shape=jax.ShapeDtypeStruct((rows, l_out), x.dtype),
            grid=(pl.cdiv(rows, tb),),
            in_specs=[pl.BlockSpec((tb, l), lambda i: (i, 0))],
            out_specs=pl.BlockSpec((tb, l_out), lambda i: (i, 0)),
            compiler_params=_params(("parallel",)),
        )(x2)
    else:
        # Time-tiled path: never DMA the chomped tail (beyond <= tl-1 lanes in
        # the ragged last time block). tl is the largest of {512, 256, 128}
        # that divides l_out exactly (zero over-read), else 128 (<=127 lanes).
        if l_out % 512 == 0:
            tl = 512
        elif l_out % 256 == 0:
            tl = 256
        else:
            tl = 128
        tb = _row_tile(rows, tl, itemsize, sub)
        out2 = pl.pallas_call(
            _copy_kernel,
            out_shape=jax.ShapeDtypeStruct((rows, l_out), x.dtype),
            grid=(pl.cdiv(rows, tb), pl.cdiv(l_out, tl)),
            in_specs=[pl.BlockSpec((tb, tl), lambda i, j: (i, j))],
            out_specs=pl.BlockSpec((tb, tl), lambda i, j: (i, j)),
            compiler_params=_params(("parallel", "parallel")),
        )(x2)

    return out2.reshape(n, c, l_out)


if __name__ == "__main__":
    key = jax.random.PRNGKey(0)

    # Case 1: small TCN-like shape (N, C, L) = (2, 4, 16), chomp = 2.
    N, C, L = 2, 4, 16
    chomp_size = 2
    x = jax.random.normal(key, (N, C, L), dtype=jnp.float32)
    ref = x[:, :, :-chomp_size]

    # 1a: default wrapper path (small-shape cutoff -> XLA slice).
    out_default = jax.block_until_ready(chomp1d(x, chomp_size))
    assert out_default.shape == (N, C, L - chomp_size)
    assert out_default.dtype == x.dtype
    assert jnp.array_equal(out_default, ref)

    # 1b: force the Pallas kernel (full-row prefix path, l_out = 14 < 128).
    out_pallas = jax.block_until_ready(chomp1d(x, chomp_size, force_pallas=True))
    assert jnp.array_equal(out_pallas, ref)

    # Case 2: time-tiled path with a ragged last lane block (l_out = 150).
    k2 = jax.random.PRNGKey(0)
    x2 = jax.random.normal(k2, (2, 4, 200), dtype=jnp.float32)
    out2 = jax.block_until_ready(chomp1d(x2, 50, force_pallas=True))
    assert jnp.array_equal(out2, x2[:, :, :-50])

    # Case 3: lane-aligned chomped length (l_out = 128, zero over-read), bf16.
    k3 = jax.random.PRNGKey(0)
    x3 = jax.random.normal(k3, (2, 4, 192), dtype=jnp.bfloat16)
    out3 = jax.block_until_ready(chomp1d(x3, 64, force_pallas=True))
    assert jnp.array_equal(out3, x3[:, :, :-64])

    # Case 4: tiny tail (chomp <= ~3% of L) -> contiguous full-row read path.
    k4 = jax.random.PRNGKey(0)
    x4 = jax.random.normal(k4, (2, 4, 256), dtype=jnp.float32)
    out4 = jax.block_until_ready(chomp1d(x4, 4, force_pallas=True))
    assert jnp.array_equal(out4, x4[:, :, :-4])

    print("KERNEL_OK")
</pallas_src>

<mosaic_0001>
module attributes {stable_mosaic.version = 11 : i64} {
  func.func @_prefix_kernel(%arg0: i32, %arg1: memref<8x16xf32, #tpu.memory_space<vmem>>, %arg2: memref<8x14xf32, #tpu.memory_space<vmem>>) attributes {dimension_semantics = [#tpu.dimension_semantics<parallel>], iteration_bounds = array<i64: 1>, scalar_prefetch = 0 : i64, scratch_operands = 0 : i64, tpu.core_type = #tpu.core_type<tc>, window_params = [{transform_indices = @transform_0, window_bounds = array<i64: 8, 16>}, {transform_indices = @transform_1, window_bounds = array<i64: 8, 14>}]} {
    %c0 = arith.constant 0 : index
    %c0_0 = arith.constant 0 : index
    %0 = vector.load %arg1[%c0, %c0_0] : memref<8x16xf32, #tpu.memory_space<vmem>>, vector<8x14xf32>
    %c0_1 = arith.constant 0 : index
    %c0_2 = arith.constant 0 : index
    %1 = vector.load %arg2[%c0_1, %c0_2] : memref<8x14xf32, #tpu.memory_space<vmem>>, vector<8x14xf32>
    tpu.vector_store %arg2[%c0_1, %c0_2], %0 {strides = array<i32>} : memref<8x14xf32, #tpu.memory_space<vmem>>, vector<8x14xf32>,
    return
  }
  func.func @transform_0(%arg0: i32) -> (i32, i32) {
    %c0_i32 = arith.constant 0 : i32
    %c0_i32_0 = arith.constant 0 : i32
    return %arg0, %c0_i32 : i32, i32
  }
  func.func @transform_1(%arg0: i32) -> (i32, i32) {
    %c0_i32 = arith.constant 0 : i32
    %c0_i32_0 = arith.constant 0 : i32
    return %arg0, %c0_i32 : i32, i32
  }
}

</mosaic_0001>

<bundles_post_ra>
// kernel: tpu_custom_call.1
= control target key start
LH: loop header
LB: loop body
LE: loop exit
PB: predicated region body
PF: predicated region fallthrough
CT: control target
= control target key end

     0   :  { %6 = vsyncpa [#allocation3], 0  ;;  %s103_s0 = inlined_call_operand.hbm [shape: f32[8,16], index: 0, kind: input, shape index: {}]   ;;  %s104_s1 = inlined_call_operand.hbm [shape: f32[8,14], index: 1, kind: output, shape index: {}]  }
   0x1   :  { %7 = vsyncpa [#allocation4], 0  ;;  %s85_s6 = smov [#allocation2]  }
   0x2   :  { %s14_s7 = sshll.u32 %s85_s6, 4  ;;  %s15_s7 = int_to_ptr.vmem [resolvable:$true] %s14_s7 }
   0x3   :  { %s49_s8 = scalar_lea.vmem %s15_s7, 128  ;;  %p54_p1 = scmp.lt.s32.totalorder %s15_s7, %s15_s7 }
   0x4   :  { %p50_p0 = scmp.ne.s32.totalorder %s15_s7, %s49_s8  ;;  %p55_p2 = scmp.lt.s32.totalorder %s49_s8, %s49_s8 }
   0x6   :  { %p56_p3 = por %p55_p2, %p54_p1 }
   0x8   :  { %p57_p4 = pnand %p56_p3, %p50_p0 }
   0xa   :  { %60 = shalt.err (!%p57_p4)
}
   0xb   :  { %17 = dma.hbm_to_vmem [thread:$0]  %s103_s0, 128, %s15_s7, [#allocation3]  }
   0xc   :  { %81 = dma.done.wait [#allocation3], 128  }
   0xd   :  { %82 = vsyncadd [#allocation3], 4294967168  ;;  %s86_s11 = smov [#allocation5]   ;;  %vm22_vm0 = vcmask 113664   ;;  %v21_v0 = vld [vmem:[#allocation2] sm:$0xff] }
   0xe   :  { %s30_s12 = sshll.u32 %s86_s11, 4  ;;  %23 = vst.msk [vmem:[#allocation5] sm:$0xff] %vm22_vm0, %v21_v0  ;;  %s31_s12 = int_to_ptr.vmem [resolvable:$true] %s30_s12 }
   0xf   :  { %s61_s13 = scalar_lea.vmem %s31_s12, 128  ;;  %p66_p6 = scmp.lt.s32.totalorder %s31_s12, %s31_s12 }
  0x10   :  { %p62_p5 = scmp.ne.s32.totalorder %s31_s12, %s61_s13  ;;  %p67_p7 = scmp.lt.s32.totalorder %s61_s13, %s61_s13 }
  0x12   :  { %p68_p8 = por %p67_p7, %p66_p6 }
  0x14   :  { %p69_p9 = pnand %p68_p8, %p62_p5 }
  0x16   :  { %72 = shalt.err (!%p69_p9)
}
  0x17   :  { %33 = dma.vmem_to_hbm [thread:$0]  %s31_s12, 128, %s104_s1, [#allocation4]  }
  0x18   :  { %83 = dma.done.wait [#allocation4], 128  }
  0x19   :  { %84 = vsyncadd [#allocation4], 4294967168 }
  0x1a   :  { %37 = vsyncpa [#allocation3], 1 }
  0x1b   :  { %38 = vsyncpa [#allocation4], 1 }

</bundles_post_ra>
